<compile_context>
chip_gen: v6e
topology: v6e:2x2x1
jax: 0.10.0
libtpu: 0.0.40
codegen_flags: <defaults>
</compile_context>

<pallas_src>
import jax
import jax.numpy as jnp
from jax.experimental import pallas as pl
from jax.experimental.pallas import tpu as pltpu

LANE = 128


# ----------------------------------------------------------------------------
# Pallas kernel: fused VGAE encoder forward (everything VMEM resident, padded)
# ----------------------------------------------------------------------------
def vgae_encoder_kernel(a_ref, x_ref, w1_ref, b1_ref, wz_ref, bz_ref, out_ref):
    a = a_ref[...]                                                   # (Np, Np) bf16

    # --- conv1: GCNConv(C_in -> 2*C_out) + ReLU  (XW before A: cheaper order) --
    xw = jnp.dot(x_ref[...], w1_ref[...],
                 preferred_element_type=jnp.float32)                 # (Np, Hp) f32
    h = jnp.dot(a, xw.astype(jnp.bfloat16),
                preferred_element_type=jnp.float32) + b1_ref[...]
    h = jnp.maximum(h, 0.0)

    # --- fused conv_mu | conv_logstd: GCNConv(2*C_out -> 2*C_out_total) -------
    hz = jnp.dot(h.astype(jnp.bfloat16), wz_ref[...],
                 preferred_element_type=jnp.float32)                 # (Np, Zp) f32
    z = jnp.dot(a, hz.astype(jnp.bfloat16),
                preferred_element_type=jnp.float32) + bz_ref[...]

    out_ref[...] = z                                                 # lane-dense store


# ----------------------------------------------------------------------------
# Wrapper: pad to MXU/lane-friendly shapes, fuse mu/logstd weights, call kernel
# ----------------------------------------------------------------------------
def _round_up(v, m):
    return (v + m - 1) // m * m


def _pad2(arr, rows, cols):
    r, c = arr.shape
    return jnp.pad(arr, ((0, rows - r), (0, cols - c)))


def vgae_encoder(a_norm, x, params):
    n, c_in = x.shape
    hidden = params["w1"].shape[1]
    c_out = params["wmu"].shape[1]

    n_p = _round_up(n, LANE)
    cin_p = _round_up(c_in, LANE)
    hid_p = _round_up(hidden, LANE)
    z_p = _round_up(2 * c_out, LANE)

    bf16 = jnp.bfloat16
    a_p = _pad2(a_norm, n_p, n_p).astype(bf16)
    x_p = _pad2(x, n_p, cin_p).astype(bf16)
    w1_p = _pad2(params["w1"], cin_p, hid_p).astype(bf16)
    b1_p = _pad2(params["b1"], 1, hid_p).astype(jnp.float32)

    # Fuse mu / logstd branches: one (hidden, 2*c_out) weight, one bias row.
    wz = jnp.concatenate([params["wmu"], params["wls"]], axis=1)
    bz = jnp.concatenate([params["bmu"], params["bls"]], axis=1)
    wz_p = _pad2(wz, hid_p, z_p).astype(bf16)
    bz_p = _pad2(bz, 1, z_p).astype(jnp.float32)

    vmem = pl.BlockSpec(memory_space=pltpu.MemorySpace.VMEM)
    out = pl.pallas_call(
        vgae_encoder_kernel,
        out_shape=jax.ShapeDtypeStruct((n_p, z_p), jnp.float32),
        in_specs=[vmem] * 6,
        out_specs=vmem,
    )(a_p, x_p, w1_p, b1_p, wz_p, bz_p)

    mu = out[:n, :c_out]
    logstd = out[:n, c_out:2 * c_out]
    return mu, logstd


# ----------------------------------------------------------------------------
# Glue (plain JAX): dense GCN normalization and deterministic param init
# ----------------------------------------------------------------------------
def gcn_norm_dense(edge_index, num_nodes):
    """Dense D^-1/2 (A + I) D^-1/2 matching PyG GCNConv's gcn_norm."""
    src, dst = edge_index
    a = jnp.zeros((num_nodes, num_nodes), jnp.float32)
    a = a.at[dst, src].set(1.0)                        # incoming-edge adjacency
    a_hat = a + jnp.eye(num_nodes, dtype=jnp.float32)  # add self loops
    deg = a_hat.sum(axis=1)
    d_inv_sqrt = jnp.where(deg > 0, 1.0 / jnp.sqrt(deg), 0.0)
    return d_inv_sqrt[:, None] * a_hat * d_inv_sqrt[None, :]


def glorot(key, shape):
    fan_in, fan_out = shape
    limit = jnp.sqrt(6.0 / (fan_in + fan_out))
    return jax.random.uniform(key, shape, jnp.float32, -limit, limit)


def init_params(key, in_channels, out_channels):
    k1, k2, k3 = jax.random.split(key, 3)
    hidden = 2 * out_channels
    return {
        "w1":  glorot(k1, (in_channels, hidden)),
        "b1":  jnp.zeros((1, hidden), jnp.float32),
        "wmu": glorot(k2, (hidden, out_channels)),
        "bmu": jnp.zeros((1, out_channels), jnp.float32),
        "wls": glorot(k3, (hidden, out_channels)),
        "bls": jnp.zeros((1, out_channels), jnp.float32),
    }


def vgae_encoder_ref(a_norm, x, p):
    """Pure-JAX f32 reference for correctness checking."""
    h = jnp.maximum(a_norm @ (x @ p["w1"]) + p["b1"], 0.0)
    mu = a_norm @ (h @ p["wmu"]) + p["bmu"]
    ls = a_norm @ (h @ p["wls"]) + p["bls"]
    return mu, ls


# ----------------------------------------------------------------------------
if __name__ == "__main__":
    key = jax.random.PRNGKey(0)
    k_x, k_e, k_p = jax.random.split(key, 3)

    num_nodes = 64
    in_channels = 16
    out_channels = 8
    num_edges = 128

    # Node features.
    x = jax.random.normal(k_x, (num_nodes, in_channels), jnp.float32)

    # Deterministic random (symmetrized) edge list, shape (2, 2E).
    ks, kd = jax.random.split(k_e)
    src = jax.random.randint(ks, (num_edges,), 0, num_nodes)
    dst = jax.random.randint(kd, (num_edges,), 0, num_nodes)
    edge_index = jnp.stack([jnp.concatenate([src, dst]),
                            jnp.concatenate([dst, src])], axis=0)

    a_norm = gcn_norm_dense(edge_index, num_nodes)
    params = init_params(k_p, in_channels, out_channels)

    mu, logstd = vgae_encoder(a_norm, x, params)
    jax.block_until_ready((mu, logstd))

    mu_ref, logstd_ref = vgae_encoder_ref(a_norm, x, params)
    assert mu.shape == (num_nodes, out_channels)
    assert logstd.shape == (num_nodes, out_channels)
    # Loose tolerance: kernel uses bf16 MXU inputs with f32 accumulation.
    assert jnp.allclose(mu, mu_ref, atol=5e-2, rtol=5e-2)
    assert jnp.allclose(logstd, logstd_ref, atol=5e-2, rtol=5e-2)

    print("KERNEL_OK")
</pallas_src>

<mosaic_0001>
module attributes {stable_mosaic.version = 11 : i64} {
  func.func @vgae_encoder_kernel(%arg0: memref<128x128xbf16, #tpu.memory_space<vmem>>, %arg1: memref<128x128xbf16, #tpu.memory_space<vmem>>, %arg2: memref<128x128xbf16, #tpu.memory_space<vmem>>, %arg3: memref<1x128xf32, #tpu.memory_space<vmem>>, %arg4: memref<128x128xbf16, #tpu.memory_space<vmem>>, %arg5: memref<1x128xf32, #tpu.memory_space<vmem>>, %arg6: memref<128x128xf32, #tpu.memory_space<vmem>>) attributes {dimension_semantics = [], scalar_prefetch = 0 : i64, scratch_operands = 0 : i64, tpu.core_type = #tpu.core_type<tc>} {
    %c0 = arith.constant 0 : index
    %c0_0 = arith.constant 0 : index
    %0 = vector.load %arg0[%c0, %c0_0] : memref<128x128xbf16, #tpu.memory_space<vmem>>, vector<128x128xbf16>
    %c0_1 = arith.constant 0 : index
    %c0_2 = arith.constant 0 : index
    %1 = vector.load %arg1[%c0_1, %c0_2] : memref<128x128xbf16, #tpu.memory_space<vmem>>, vector<128x128xbf16>
    %c0_3 = arith.constant 0 : index
    %c0_4 = arith.constant 0 : index
    %2 = vector.load %arg2[%c0_3, %c0_4] : memref<128x128xbf16, #tpu.memory_space<vmem>>, vector<128x128xbf16>
    %cst = arith.constant dense<0.000000e+00> : vector<128x128xf32>
    %3 = tpu.matmul %1, %2, %cst {dimension_numbers = #tpu.dot_dimension_numbers<[1], [0], [0], [1], [0, 0, 1, 1], [], []>} : vector<128x128xbf16>, vector<128x128xbf16>, vector<128x128xf32> -> vector<128x128xf32>
    %4 = arith.truncf %3 : vector<128x128xf32> to vector<128x128xbf16>
    %cst_5 = arith.constant dense<0.000000e+00> : vector<128x128xf32>
    %5 = tpu.matmul %0, %4, %cst_5 {dimension_numbers = #tpu.dot_dimension_numbers<[1], [0], [0], [1], [0, 0, 1, 1], [], []>} : vector<128x128xbf16>, vector<128x128xbf16>, vector<128x128xf32> -> vector<128x128xf32>
    %c0_6 = arith.constant 0 : index
    %c0_7 = arith.constant 0 : index
    %6 = vector.load %arg3[%c0_6, %c0_7] : memref<1x128xf32, #tpu.memory_space<vmem>>, vector<1x128xf32>
    %7 = vector.broadcast %6 : vector<1x128xf32> to vector<128x128xf32>
    %8 = arith.addf %5, %7 : vector<128x128xf32>
    %cst_8 = arith.constant 0.000000e+00 : f32
    %9 = vector.broadcast %cst_8 : f32 to vector<128x128xf32>
    %10 = arith.maximumf %8, %9 : vector<128x128xf32>
    %11 = arith.truncf %10 : vector<128x128xf32> to vector<128x128xbf16>
    %c0_9 = arith.constant 0 : index
    %c0_10 = arith.constant 0 : index
    %12 = vector.load %arg4[%c0_9, %c0_10] : memref<128x128xbf16, #tpu.memory_space<vmem>>, vector<128x128xbf16>
    %cst_11 = arith.constant dense<0.000000e+00> : vector<128x128xf32>
    %13 = tpu.matmul %11, %12, %cst_11 {dimension_numbers = #tpu.dot_dimension_numbers<[1], [0], [0], [1], [0, 0, 1, 1], [], []>} : vector<128x128xbf16>, vector<128x128xbf16>, vector<128x128xf32> -> vector<128x128xf32>
    %14 = arith.truncf %13 : vector<128x128xf32> to vector<128x128xbf16>
    %cst_12 = arith.constant dense<0.000000e+00> : vector<128x128xf32>
    %15 = tpu.matmul %0, %14, %cst_12 {dimension_numbers = #tpu.dot_dimension_numbers<[1], [0], [0], [1], [0, 0, 1, 1], [], []>} : vector<128x128xbf16>, vector<128x128xbf16>, vector<128x128xf32> -> vector<128x128xf32>
    %c0_13 = arith.constant 0 : index
    %c0_14 = arith.constant 0 : index
    %16 = vector.load %arg5[%c0_13, %c0_14] : memref<1x128xf32, #tpu.memory_space<vmem>>, vector<1x128xf32>
    %17 = vector.broadcast %16 : vector<1x128xf32> to vector<128x128xf32>
    %18 = arith.addf %15, %17 : vector<128x128xf32>
    %c0_15 = arith.constant 0 : index
    %c0_16 = arith.constant 0 : index
    %19 = vector.load %arg6[%c0_15, %c0_16] : memref<128x128xf32, #tpu.memory_space<vmem>>, vector<128x128xf32>
    tpu.vector_store %arg6[%c0_15, %c0_16], %18 {strides = array<i32>} : memref<128x128xf32, #tpu.memory_space<vmem>>, vector<128x128xf32>,
    return
  }
}

</mosaic_0001>

<bundles_post_ra>
// kernel: tpu_custom_call.1
= control target key start
LH: loop header
LB: loop body
LE: loop exit
PB: predicated region body
PF: predicated region fallthrough
CT: control target
= control target key end

     0   :  { %11 = vsyncpa [#allocation3], 0  ;;  %s1297_s0 = inlined_call_operand.hbm [shape: bf16[128,128], index: 0, kind: input, shape index: {}]   ;;  %s1298_s1 = inlined_call_operand.hbm [shape: bf16[128,128], index: 1, kind: input, shape index: {}]   ;;  %s1299_s2 = inlined_call_operand.hbm [shape: bf16[128,128], index: 2, kind: input, shape index: {}]   ;;  %s1300_s3 = inlined_call_operand.vmem [shape: f32[1,128], index: 3, kind: input, shape index: {}]   ;;  %s1301_s4 = inlined_call_operand.hbm [shape: bf16[128,128], index: 4, kind: input, shape index: {}]   ;;  %s1302_s5 = inlined_call_operand.vmem [shape: f32[1,128], index: 5, kind: input, shape index: {}]   ;;  %s1303_s6 = inlined_call_operand.hbm [shape: f32[128,128], index: 6, kind: output, shape index: {}]  }
   0x1   :  { %12 = vsyncpa [#allocation6], 0 }
   0x2   :  { %13 = vsyncpa [#allocation9], 0 }
   0x3   :  { %14 = vsyncpa [#allocation4], 0  ;;  %s1188_s21 = smov [#allocation5]   ;;  %s1189_s23 = smov [#allocation2]  }
   0x4   :  { %s32_s22 = sshll.u32 %s1188_s21, 4  ;;  %s20_s24 = sshll.u32 %s1189_s23, 4  ;;  %s33_s22 = int_to_ptr.vmem [resolvable:$true] %s32_s22  ;;  %s21_s24 = int_to_ptr.vmem [resolvable:$true] %s20_s24 }
   0x5   :  { %s1088_s25 = scalar_lea.vmem %s33_s22, 1024  ;;  %p1093_p1 = scmp.lt.s32.totalorder %s33_s22, %s33_s22 }
   0x6   :  { %p1089_p0 = scmp.ne.s32.totalorder %s33_s22, %s1088_s25  ;;  %p1094_p2 = scmp.lt.s32.totalorder %s1088_s25, %s1088_s25 }
   0x8   :  { %p1095_p3 = por %p1094_p2, %p1093_p1 }
   0xa   :  { %p1096_p4 = pnand %p1095_p3, %p1089_p0 }
   0xc   :  { %1099 = shalt.err (!%p1096_p4)
}
   0xd   :  { %s1190_s26 = smov 64   ;;  %s1191_s27 = smov 4  }
   0xe   :  { %38 = dma.hbm_to_vmem [thread:$0]  %s1298_s1, 1024, %s33_s22, [#allocation6], %s1190_s26, %s1190_s26, %s1191_s27  }
   0xf   :  { %s1108_s30 = scalar_lea.vmem %s21_s24, 1024  ;;  %p1113_p6 = scmp.lt.s32.totalorder %s21_s24, %s21_s24 }
  0x10   :  { %p1109_p5 = scmp.ne.s32.totalorder %s21_s24, %s1108_s30  ;;  %p1114_p7 = scmp.lt.s32.totalorder %s1108_s30, %s1108_s30 }
  0x12   :  { %p1115_p8 = por %p1114_p7, %p1113_p6 }
  0x14   :  { %p1116_p9 = pnand %p1115_p8, %p1109_p5 }
  0x16   :  { %1119 = shalt.err (!%p1116_p9)
}
  0x17   :  { %26 = dma.hbm_to_vmem [thread:$0]  %s1297_s0, 1024, %s21_s24, [#allocation3], %s1190_s26, %s1190_s26, %s1191_s27  }
  0x18   :  { %s1192_s9 = smov [#allocation7]   ;;  %s1193_s11 = smov [#allocation8]  }
  0x19   :  { %s44_s10 = sshll.u32 %s1192_s9, 4  ;;  %s58_s12 = sshll.u32 %s1193_s11, 4  ;;  %s45_s10 = int_to_ptr.vmem [resolvable:$true] %s44_s10  ;;  %s59_s12 = int_to_ptr.vmem [resolvable:$true] %s58_s12 }
  0x1a   :  { %s1128_s1 = scalar_lea.vmem %s45_s10, 1024  ;;  %p1133_p11 = scmp.lt.s32.totalorder %s45_s10, %s45_s10 }
  0x1b   :  { %p1129_p10 = scmp.ne.s32.totalorder %s45_s10, %s1128_s1  ;;  %p1134_p12 = scmp.lt.s32.totalorder %s1128_s1, %s1128_s1 }
  0x1d   :  { %p1135_p13 = por %p1134_p12, %p1133_p11 }
  0x1f   :  { %p1136_p0 = pnand %p1135_p13, %p1129_p10 }
  0x21   :  { %1139 = shalt.err (!%p1136_p0)
}
  0x22   :  { %50 = dma.hbm_to_vmem [thread:$0]  %s1299_s2, 1024, %s45_s10, [#allocation6], %s1190_s26, %s1190_s26, %s1191_s27  }
  0x23   :  { %s1148_s0 = scalar_lea.vmem %s59_s12, 1024  ;;  %p1153_p2 = scmp.lt.s32.totalorder %s59_s12, %s59_s12 }
  0x24   :  { %p1149_p1 = scmp.ne.s32.totalorder %s59_s12, %s1148_s0  ;;  %p1154_p3 = scmp.lt.s32.totalorder %s1148_s0, %s1148_s0 }
  0x26   :  { %p1155_p4 = por %p1154_p3, %p1153_p2 }
  0x28   :  { %p1156_p5 = pnand %p1155_p4, %p1149_p1 }
  0x2a   :  { %1159 = shalt.err (!%p1156_p5)
}
  0x2b   :  { %64 = dma.hbm_to_vmem [thread:$0]  %s1301_s4, 1024, %s59_s12, [#allocation9], %s1190_s26, %s1190_s26, %s1191_s27  }
  0x2c   :  { %1180 = dma.done.wait [#allocation3], 1024  }
  0x2d   :  { %1181 = vsyncadd [#allocation3], 4294966272 }
  0x2e   :  { %1182 = dma.done.wait [#allocation6], 2048  }
  0x2f   :  { %1183 = vsyncadd [#allocation6], 4294965248 }
  0x30   :  { %1184 = dma.done.wait [#allocation9], 1024  }
  0x31   :  { %1185 = vsyncadd [#allocation9], 4294966272  ;;  %v1048_v0 = vld [vmem:[#allocation7 + $0x38] sm:$0xff]   ;;  %v1049_v1 = vld [vmem:[#allocation7 + $0x30] sm:$0xff]  }
  0x32   :  { %911 = vmatprep.subr.bf16.mxu0 %v1048_v0  ;;  %v1050_v2 = vld [vmem:[#allocation7 + $0x28] sm:$0xff]   ;;  %v1051_v3 = vld [vmem:[#allocation7 + $0x20] sm:$0xff]   ;;  %v1052_v5 = vld [vmem:[#allocation7 + $0x18] sm:$0xff]  }
  0x33   :  { %912 = vmatpush3.bf16.msra.mxu0 %v1048_v0  ;;  %v1056_v4 = vld [vmem:[#allocation5] sm:$0xff]   ;;  %v1053_v6 = vld [vmem:[#allocation7 + $0x10] sm:$0xff]   ;;  %v1054_v7 = vld [vmem:[#allocation7 + $0x8] sm:$0xff]  }
  0x34   :  { %913 = vmatprep.subr.bf16.mxu0 %v1049_v1  ;;  %927 = vmatprep.mubr.bf16.mxu0 %v1056_v4  ;;  %v1055_v8 = vld [vmem:[#allocation7] sm:$0xff]   ;;  %v1057_v9 = vld [vmem:[#allocation5 + $0x8] sm:$0xff]   ;;  %v1058_v10 = vld [vmem:[#allocation5 + $0x10] sm:$0xff]  }
  0x35   :  { %v1059_v11 = vld [vmem:[#allocation5 + $0x18] sm:$0xff]   ;;  %v1060_v12 = vld [vmem:[#allocation5 + $0x20] sm:$0xff]   ;;  %v1061_v13 = vld [vmem:[#allocation5 + $0x28] sm:$0xff]  }
  0x36   :  { %v1062_v14 = vld [vmem:[#allocation5 + $0x30] sm:$0xff]   ;;  %v1063_v15 = vld [vmem:[#allocation5 + $0x38] sm:$0xff]   ;;  %v1256_v16 = vld [vmem:[#allocation2] sm:$0xff]  }
  0x37   :  { %914 = vmatpush3.bf16.msra.mxu0 %v1049_v1  ;;  %959 = vmatprep.mubr.bf16.mxu1 %v1256_v16  ;;  %v1072_v17 = vld [vmem:[#allocation8 + $0x38] sm:$0xff]   ;;  %v1073_v18 = vld [vmem:[#allocation8 + $0x30] sm:$0xff]   ;;  %v1074_v19 = vld [vmem:[#allocation8 + $0x28] sm:$0xff]  }
  0x38   :  { %915 = vmatprep.subr.bf16.mxu0 %v1050_v2  ;;  %v1075_v20 = vld [vmem:[#allocation8 + $0x20] sm:$0xff]   ;;  %v1076_v21 = vld [vmem:[#allocation8 + $0x18] sm:$0xff]   ;;  %v1259_v46 = vld [vmem:[#allocation2 + $0x8] sm:$0xff]  }
  0x39   :  { %v1261_v47 = vld [vmem:[#allocation2 + $0x10] sm:$0xff]   ;;  %v1265_v48 = vld [vmem:[#allocation2 + $0x18] sm:$0xff]   ;;  %v1267_v49 = vld [vmem:[#allocation2 + $0x20] sm:$0xff]  }
  0x3a   :  { %v1271_v50 = vld [vmem:[#allocation2 + $0x28] sm:$0xff]   ;;  %v1273_v51 = vld [vmem:[#allocation2 + $0x30] sm:$0xff]   ;;  %v1277_v52 = vld [vmem:[#allocation2 + $0x38] sm:$0xff]  }
  0x3b   :  { %916 = vmatpush3.bf16.msra.mxu0 %v1050_v2  ;;  %v1077_v53 = vld [vmem:[#allocation8 + $0x10] sm:$0xff]   ;;  %v1078_v54 = vld [vmem:[#allocation8 + $0x8] sm:$0xff]   ;;  %v1079_v55 = vld [vmem:[#allocation8] sm:$0xff]  }
  0x3c   :  { %917 = vmatprep.subr.bf16.mxu0 %v1051_v3  ;;  %v829_v58 = vld [vmem:[%s1300_s3] ss:$0 sm:$0xff] }
  0x3f   :  { %918 = vmatpush3.bf16.msra.mxu0 %v1051_v3 }
  0x40   :  { %919 = vmatprep.subr.bf16.mxu0 %v1052_v5 }
  0x43   :  { %920 = vmatpush3.bf16.msra.mxu0 %v1052_v5 }
  0x44   :  { %921 = vmatprep.subr.bf16.mxu0 %v1053_v6 }
  0x47   :  { %922 = vmatpush3.bf16.msra.mxu0 %v1053_v6 }
  0x48   :  { %923 = vmatprep.subr.bf16.mxu0 %v1054_v7 }
  0x4b   :  { %924 = vmatpush3.bf16.msra.mxu0 %v1054_v7 }
  0x4c   :  { %925 = vmatprep.subr.bf16.mxu0 %v1055_v8 }
  0x4f   :  { %926 = vmatpush3.bf16.msra.mxu0 %v1055_v8 }
  0x50   :  { %975 = vmatprep.subr.bf16.mxu0 %v1072_v17 }
  0x52   :  { %928 = vmatmul.mubr.bf16.vlgmr.msra.gmra.mxu0 %v1057_v9 }
  0x53   :  { %931 = vmatprep.mubr.bf16.mxu0 %v1058_v10  ;;  %976 = vmatpush3.bf16.msra.mxu0 %v1072_v17 }
  0x54   :  { %977 = vmatprep.subr.bf16.mxu0 %v1073_v18 }
  0x57   :  { %978 = vmatpush3.bf16.msra.mxu0 %v1073_v18 }
  0x58   :  { %979 = vmatprep.subr.bf16.mxu0 %v1074_v19 }
  0x5a   :  { %932 = vmatmul.mubr.bf16.gmra.mxu0 %v1059_v11 }
  0x5b   :  { %935 = vmatprep.mubr.bf16.mxu0 %v1060_v12  ;;  %980 = vmatpush3.bf16.msra.mxu0 %v1074_v19 }
  0x5c   :  { %981 = vmatprep.subr.bf16.mxu0 %v1075_v20 }
  0x5f   :  { %982 = vmatpush3.bf16.msra.mxu0 %v1075_v20 }
  0x60   :  { %983 = vmatprep.subr.bf16.mxu0 %v1076_v21 }
  0x62   :  { %936 = vmatmul.mubr.bf16.gmra.mxu0 %v1061_v13 }
  0x63   :  { %939 = vmatprep.mubr.bf16.mxu0 %v1062_v14  ;;  %984 = vmatpush3.bf16.msra.mxu0 %v1076_v21 }
  0x64   :  { %985 = vmatprep.subr.bf16.mxu0 %v1077_v53 }
  0x67   :  { %986 = vmatpush3.bf16.msra.mxu0 %v1077_v53 }
  0x68   :  { %987 = vmatprep.subr.bf16.mxu0 %v1078_v54 }
  0x6a   :  { %940 = vmatmul.mubr.bf16.gmra.mxu0 %v1063_v15 }
  0x6b   :  { %988 = vmatpush3.bf16.msra.mxu0 %v1078_v54 }
  0x6c   :  { %989 = vmatprep.subr.bf16.mxu0 %v1079_v55 }
  0x6f   :  { %990 = vmatpush3.bf16.msra.mxu0 %v1079_v55 }
 0x112   :  { %v929_v22 = vpop.f32.mrf.mxu0 }
 0x114   :  { %v258_v23 = vpop.f32.mrf.mxu0 }
 0x116   :  { %v930_v24 = vpop.f32.mrf.mxu0 }
 0x117   :  { %v322_v44 = vpack.c.bf16 %v930_v24, %v929_v22 }
 0x118   :  { %v261_v25 = vpop.f32.mrf.mxu0 }
 0x119   :  { %v321_v45 = vpack.c.bf16 %v261_v25, %v258_v23 }
 0x11a   :  { %v933_v26 = vpop.f32.mrf.mxu0 }
 0x11c   :  { %v274_v27 = vpop.f32.mrf.mxu0 }
 0x11e   :  { %v934_v28 = vpop.f32.mrf.mxu0 }
 0x11f   :  { %v324_v42 = vpack.c.bf16 %v934_v28, %v933_v26 }
 0x120   :  { %v277_v29 = vpop.f32.mrf.mxu0 }
 0x121   :  { %v323_v43 = vpack.c.bf16 %v277_v29, %v274_v27 }
 0x122   :  { %v937_v30 = vpop.f32.mrf.mxu0 }
 0x124   :  { %v290_v31 = vpop.f32.mrf.mxu0 }
 0x126   :  { %v938_v32 = vpop.f32.mrf.mxu0 }
 0x127   :  { %v326_v40 = vpack.c.bf16 %v938_v32, %v937_v30 }
 0x128   :  { %v293_v33 = vpop.f32.mrf.mxu0 }
 0x129   :  { %v325_v41 = vpack.c.bf16 %v293_v33, %v290_v31 }
 0x12a   :  { %v941_v34 = vpop.f32.mrf.mxu0 }
 0x12c   :  { %v306_v35 = vpop.f32.mrf.mxu0 }
 0x12e   :  { %v942_v36 = vpop.f32.mrf.mxu0 }
 0x12f   :  { %v328_v37 = vpack.c.bf16 %v942_v36, %v941_v34 }
 0x130   :  { %v309_v38 = vpop.f32.mrf.mxu0 }
 0x131   :  { %v327_v39 = vpack.c.bf16 %v309_v38, %v306_v35  ;;  %943 = vmatprep.subr.bf16.mxu1 %v328_v37 }
 0x132   :  { %944 = vmatpush3.bf16.msra.mxu1 %v328_v37 }
 0x133   :  { %945 = vmatprep.subr.bf16.mxu1 %v327_v39 }
 0x136   :  { %946 = vmatpush3.bf16.msra.mxu1 %v327_v39 }
 0x137   :  { %947 = vmatprep.subr.bf16.mxu1 %v326_v40 }
 0x13a   :  { %948 = vmatpush3.bf16.msra.mxu1 %v326_v40 }
 0x13b   :  { %949 = vmatprep.subr.bf16.mxu1 %v325_v41 }
 0x13e   :  { %950 = vmatpush3.bf16.msra.mxu1 %v325_v41 }
 0x13f   :  { %951 = vmatprep.subr.bf16.mxu1 %v324_v42 }
 0x142   :  { %952 = vmatpush3.bf16.msra.mxu1 %v324_v42 }
 0x143   :  { %953 = vmatprep.subr.bf16.mxu1 %v323_v43 }
 0x146   :  { %954 = vmatpush3.bf16.msra.mxu1 %v323_v43 }
 0x147   :  { %955 = vmatprep.subr.bf16.mxu1 %v322_v44 }
 0x14a   :  { %956 = vmatpush3.bf16.msra.mxu1 %v322_v44 }
 0x14b   :  { %957 = vmatprep.subr.bf16.mxu1 %v321_v45 }
 0x14e   :  { %958 = vmatpush3.bf16.msra.mxu1 %v321_v45 }
 0x151   :  { %960 = vmatmul.mubr.bf16.vlgmr.msra.gmra.mxu1 %v1259_v46 }
 0x152   :  { %963 = vmatprep.mubr.bf16.mxu1 %v1261_v47 }
 0x159   :  { %964 = vmatmul.mubr.bf16.gmra.mxu1 %v1265_v48 }
 0x15a   :  { %967 = vmatprep.mubr.bf16.mxu1 %v1267_v49 }
 0x161   :  { %968 = vmatmul.mubr.bf16.gmra.mxu1 %v1271_v50 }
 0x162   :  { %971 = vmatprep.mubr.bf16.mxu1 %v1273_v51 }
 0x169   :  { %972 = vmatmul.mubr.bf16.gmra.mxu1 %v1277_v52 }
 0x16a   :  { %1023 = vmatprep.mubr.bf16.mxu1 %v1256_v16 }
 0x211   :  { %v961_v56 = vpop.f32.mrf.mxu1 }
 0x212   :  { %v427_v62 = vadd.f32 %v961_v56, %v829_v58 }
 0x213   :  { %v418_v57 = vpop.f32.mrf.mxu1 }
 0x214   :  { %v419_v60 = vadd.f32 %v829_v58, %v418_v57  ;;  %v483_v5 = vmax.f32 %v427_v62, 0.0 }
 0x215   :  { %v962_v59 = vpop.f32.mrf.mxu1 }
 0x216   :  { %v430_v61 = vadd.f32 %v962_v59, %v829_v58  ;;  %v481_v3 = vmax.f32 %v419_v60, 0.0 }
 0x217   :  { %v421_v63 = vpop.f32.mrf.mxu1 }
 0x218   :  { %v422_v0 = vadd.f32 %v829_v58, %v421_v63  ;;  %v484_v1 = vmax.f32 %v430_v61, 0.0 }
 0x219   :  { %v965_v2 = vpop.f32.mrf.mxu1 }
 0x21a   :  { %v482_v4 = vmax.f32 %v422_v0, 0.0  ;;  %v498_v8 = vpack.c.bf16 %v484_v1, %v483_v5  ;;  %v443_v12 = vadd.f32 %v965_v2, %v829_v58 }
 0x21b   :  { %v434_v6 = vpop.f32.mrf.mxu1 }
 0x21c   :  { %v497_v7 = vpack.c.bf16 %v482_v4, %v481_v3  ;;  %v435_v10 = vadd.f32 %v829_v58, %v434_v6  ;;  %v487_v19 = vmax.f32 %v443_v12, 0.0 }
 0x21d   :  { %v966_v9 = vpop.f32.mrf.mxu1 }
 0x21e   :  { %v446_v11 = vadd.f32 %v966_v9, %v829_v58  ;;  %991 = vmatprep.mubr.bf16.mxu0 %v497_v7  ;;  %v485_v17 = vmax.f32 %v435_v10, 0.0 }
 0x21f   :  { %v437_v13 = vpop.f32.mrf.mxu1  ;;  %992 = vmatmul.mubr.bf16.vlgmr.msra.gmra.mxu0 %v498_v8 }
 0x220   :  { %v438_v14 = vadd.f32 %v829_v58, %v437_v13  ;;  %v488_v15 = vmax.f32 %v446_v11, 0.0 }
 0x221   :  { %v969_v16 = vpop.f32.mrf.mxu1 }
 0x222   :  { %v486_v18 = vmax.f32 %v438_v14, 0.0  ;;  %v500_v22 = vpack.c.bf16 %v488_v15, %v487_v19  ;;  %v459_v26 = vadd.f32 %v969_v16, %v829_v58  ;;  %v846_v16 = vld [vmem:[%s1302_s5] ss:$0 sm:$0xff]  ;;  %s1194_s5 = smov [#allocation10]  }
 0x223   :  { %v450_v20 = vpop.f32.mrf.mxu1  ;;  %s799_s18 = sshll.u32 %s1194_s5, 4  ;;  %s800_s18 = int_to_ptr.vmem [resolvable:$true] %s799_s18 }
 0x224   :  { %v499_v21 = vpack.c.bf16 %v486_v18, %v485_v17  ;;  %v451_v24 = vadd.f32 %v829_v58, %v450_v20  ;;  %v491_v33 = vmax.f32 %v459_v26, 0.0  ;;  %s1160_s19 = scalar_lea.vmem %s800_s18, 2048  ;;  %p1165_p7 = scmp.lt.s32.totalorder %s800_s18, %s800_s18 }
 0x225   :  { %v970_v23 = vpop.f32.mrf.mxu1  ;;  %p1161_p6 = scmp.ne.s32.totalorder %s800_s18, %s1160_s19  ;;  %p1166_p8 = scmp.lt.s32.totalorder %s1160_s19, %s1160_s19 }
 0x226   :  { %v462_v25 = vadd.f32 %v970_v23, %v829_v58  ;;  %995 = vmatprep.mubr.bf16.mxu0 %v499_v21  ;;  %v489_v31 = vmax.f32 %v451_v24, 0.0 }
 0x227   :  { %v453_v27 = vpop.f32.mrf.mxu1  ;;  %996 = vmatmul.mubr.bf16.gmra.mxu0 %v500_v22  ;;  %p1167_p9 = por %p1166_p8, %p1165_p7 }
 0x228   :  { %v454_v28 = vadd.f32 %v829_v58, %v453_v27  ;;  %v492_v29 = vmax.f32 %v462_v25, 0.0 }
 0x229   :  { %v973_v30 = vpop.f32.mrf.mxu1  ;;  %p1168_p10 = pnand %p1167_p9, %p1161_p6 }
 0x22a   :  { %v490_v32 = vmax.f32 %v454_v28, 0.0  ;;  %v502_v36 = vpack.c.bf16 %v492_v29, %v491_v33  ;;  %v475_v40 = vadd.f32 %v973_v30, %v829_v58 }
 0x22b   :  { %v466_v34 = vpop.f32.mrf.mxu1 }
 0x22c   :  { %v501_v35 = vpack.c.bf16 %v490_v32, %v489_v31  ;;  %v467_v38 = vadd.f32 %v829_v58, %v466_v34  ;;  %v495_v53 = vmax.f32 %v475_v40, 0.0 }
 0x22d   :  { %v974_v37 = vpop.f32.mrf.mxu1 }
 0x22e   :  { %v478_v39 = vadd.f32 %v974_v37, %v829_v58  ;;  %999 = vmatprep.mubr.bf16.mxu0 %v501_v35  ;;  %v493_v44 = vmax.f32 %v467_v38, 0.0 }
 0x22f   :  { %v469_v41 = vpop.f32.mrf.mxu1  ;;  %1000 = vmatmul.mubr.bf16.gmra.mxu0 %v502_v36 }
 0x230   :  { %v470_v42 = vadd.f32 %v829_v58, %v469_v41  ;;  %v496_v43 = vmax.f32 %v478_v39, 0.0 }
 0x232   :  { %v494_v45 = vmax.f32 %v470_v42, 0.0  ;;  %v504_v55 = vpack.c.bf16 %v496_v43, %v495_v53 }
 0x234   :  { %v503_v54 = vpack.c.bf16 %v494_v45, %v493_v44 }
 0x236   :  { %1003 = vmatprep.mubr.bf16.mxu0 %v503_v54 }
 0x237   :  { %1004 = vmatmul.mubr.bf16.gmra.mxu0 %v504_v55 }
 0x2df   :  { %v993_v56 = vpop.f32.mrf.mxu0 }
 0x2e1   :  { %v603_v57 = vpop.f32.mrf.mxu0 }
 0x2e3   :  { %v994_v59 = vpop.f32.mrf.mxu0 }
 0x2e4   :  { %v667_v14 = vpack.c.bf16 %v994_v59, %v993_v56 }
 0x2e5   :  { %v606_v60 = vpop.f32.mrf.mxu0 }
 0x2e6   :  { %v666_v15 = vpack.c.bf16 %v606_v60, %v603_v57 }
 0x2e7   :  { %v997_v61 = vpop.f32.mrf.mxu0 }
 0x2e9   :  { %v619_v62 = vpop.f32.mrf.mxu0 }
 0x2eb   :  { %v998_v63 = vpop.f32.mrf.mxu0 }
 0x2ec   :  { %v669_v12 = vpack.c.bf16 %v998_v63, %v997_v61 }
 0x2ed   :  { %v622_v0 = vpop.f32.mrf.mxu0 }
 0x2ee   :  { %v668_v13 = vpack.c.bf16 %v622_v0, %v619_v62 }
 0x2ef   :  { %v1001_v1 = vpop.f32.mrf.mxu0 }
 0x2f1   :  { %v635_v2 = vpop.f32.mrf.mxu0 }
 0x2f3   :  { %v1002_v3 = vpop.f32.mrf.mxu0 }
 0x2f4   :  { %v671_v10 = vpack.c.bf16 %v1002_v3, %v1001_v1 }
 0x2f5   :  { %v638_v58 = vpop.f32.mrf.mxu0 }
 0x2f6   :  { %v670_v11 = vpack.c.bf16 %v638_v58, %v635_v2 }
 0x2f7   :  { %v1005_v4 = vpop.f32.mrf.mxu0 }
 0x2f9   :  { %v651_v5 = vpop.f32.mrf.mxu0 }
 0x2fb   :  { %v1006_v6 = vpop.f32.mrf.mxu0 }
 0x2fc   :  { %v673_v7 = vpack.c.bf16 %v1006_v6, %v1005_v4 }
 0x2fd   :  { %v654_v8 = vpop.f32.mrf.mxu0 }
 0x2fe   :  { %v672_v9 = vpack.c.bf16 %v654_v8, %v651_v5  ;;  %1007 = vmatprep.subr.bf16.mxu1 %v673_v7 }
 0x2ff   :  { %1008 = vmatpush3.bf16.msra.mxu1 %v673_v7 }
 0x300   :  { %1009 = vmatprep.subr.bf16.mxu1 %v672_v9 }
 0x303   :  { %1010 = vmatpush3.bf16.msra.mxu1 %v672_v9 }
 0x304   :  { %1011 = vmatprep.subr.bf16.mxu1 %v671_v10 }
 0x307   :  { %1012 = vmatpush3.bf16.msra.mxu1 %v671_v10 }
 0x308   :  { %1013 = vmatprep.subr.bf16.mxu1 %v670_v11 }
 0x30b   :  { %1014 = vmatpush3.bf16.msra.mxu1 %v670_v11 }
 0x30c   :  { %1015 = vmatprep.subr.bf16.mxu1 %v669_v12 }
 0x30f   :  { %1016 = vmatpush3.bf16.msra.mxu1 %v669_v12 }
 0x310   :  { %1017 = vmatprep.subr.bf16.mxu1 %v668_v13 }
 0x313   :  { %1018 = vmatpush3.bf16.msra.mxu1 %v668_v13 }
 0x314   :  { %1019 = vmatprep.subr.bf16.mxu1 %v667_v14 }
 0x317   :  { %1020 = vmatpush3.bf16.msra.mxu1 %v667_v14 }
 0x318   :  { %1021 = vmatprep.subr.bf16.mxu1 %v666_v15 }
 0x31b   :  { %1022 = vmatpush3.bf16.msra.mxu1 %v666_v15 }
 0x31e   :  { %1024 = vmatmul.mubr.bf16.vlgmr.msra.gmra.mxu1 %v1259_v46 }
 0x31f   :  { %1027 = vmatprep.mubr.bf16.mxu1 %v1261_v47 }
 0x326   :  { %1028 = vmatmul.mubr.bf16.gmra.mxu1 %v1265_v48 }
 0x327   :  { %1031 = vmatprep.mubr.bf16.mxu1 %v1267_v49 }
 0x32e   :  { %1032 = vmatmul.mubr.bf16.gmra.mxu1 %v1271_v50 }
 0x32f   :  { %1035 = vmatprep.mubr.bf16.mxu1 %v1273_v51 }
 0x336   :  { %1036 = vmatmul.mubr.bf16.gmra.mxu1 %v1277_v52 }
 0x3de   :  { %v1025_v17 = vpop.f32.mrf.mxu1 }
 0x3df   :  { %v724_v18 = vadd.f32 %v1025_v17, %v846_v16 }
 0x3e0   :  { %v715_v19 = vpop.f32.mrf.mxu1 }
 0x3e1   :  { %780 = vst [vmem:[#allocation10 + $0x10] sm:$0xff] %v724_v18  ;;  %v716_v46 = vadd.f32 %v846_v16, %v715_v19 }
 0x3e2   :  { %v1026_v47 = vpop.f32.mrf.mxu1 }
 0x3e3   :  { %778 = vst [vmem:[#allocation10] sm:$0xff] %v716_v46  ;;  %v727_v48 = vadd.f32 %v1026_v47, %v846_v16 }
 0x3e4   :  { %v718_v20 = vpop.f32.mrf.mxu1 }
 0x3e5   :  { %781 = vst [vmem:[#allocation10 + $0x18] sm:$0xff] %v727_v48  ;;  %v719_v49 = vadd.f32 %v846_v16, %v718_v20 }
 0x3e6   :  { %v1029_v50 = vpop.f32.mrf.mxu1 }
 0x3e7   :  { %779 = vst [vmem:[#allocation10 + $0x8] sm:$0xff] %v719_v49  ;;  %v740_v51 = vadd.f32 %v1029_v50, %v846_v16 }
 0x3e8   :  { %v731_v21 = vpop.f32.mrf.mxu1 }
 0x3e9   :  { %784 = vst [vmem:[#allocation10 + $0x30] sm:$0xff] %v740_v51  ;;  %v732_v52 = vadd.f32 %v846_v16, %v731_v21 }
 0x3ea   :  { %v1030_v22 = vpop.f32.mrf.mxu1 }
 0x3eb   :  { %782 = vst [vmem:[#allocation10 + $0x20] sm:$0xff] %v732_v52  ;;  %v743_v23 = vadd.f32 %v1030_v22, %v846_v16 }
 0x3ec   :  { %v734_v24 = vpop.f32.mrf.mxu1 }
 0x3ed   :  { %785 = vst [vmem:[#allocation10 + $0x38] sm:$0xff] %v743_v23  ;;  %v735_v25 = vadd.f32 %v846_v16, %v734_v24 }
 0x3ee   :  { %v1033_v26 = vpop.f32.mrf.mxu1 }
 0x3ef   :  { %783 = vst [vmem:[#allocation10 + $0x28] sm:$0xff] %v735_v25  ;;  %v756_v27 = vadd.f32 %v1033_v26, %v846_v16 }
 0x3f0   :  { %v747_v28 = vpop.f32.mrf.mxu1 }
 0x3f1   :  { %788 = vst [vmem:[#allocation10 + $0x50] sm:$0xff] %v756_v27  ;;  %v748_v29 = vadd.f32 %v846_v16, %v747_v28 }
 0x3f2   :  { %v1034_v30 = vpop.f32.mrf.mxu1 }
 0x3f3   :  { %786 = vst [vmem:[#allocation10 + $0x40] sm:$0xff] %v748_v29  ;;  %v759_v31 = vadd.f32 %v1034_v30, %v846_v16 }
 0x3f4   :  { %v750_v32 = vpop.f32.mrf.mxu1 }
 0x3f5   :  { %789 = vst [vmem:[#allocation10 + $0x58] sm:$0xff] %v759_v31  ;;  %v751_v33 = vadd.f32 %v846_v16, %v750_v32 }
 0x3f6   :  { %v1037_v34 = vpop.f32.mrf.mxu1 }
 0x3f7   :  { %787 = vst [vmem:[#allocation10 + $0x48] sm:$0xff] %v751_v33  ;;  %v772_v35 = vadd.f32 %v1037_v34, %v846_v16 }
 0x3f8   :  { %v763_v36 = vpop.f32.mrf.mxu1 }
 0x3f9   :  { %792 = vst [vmem:[#allocation10 + $0x70] sm:$0xff] %v772_v35  ;;  %v764_v37 = vadd.f32 %v846_v16, %v763_v36 }
 0x3fa   :  { %v1038_v38 = vpop.f32.mrf.mxu1 }
 0x3fb   :  { %790 = vst [vmem:[#allocation10 + $0x60] sm:$0xff] %v764_v37  ;;  %v775_v39 = vadd.f32 %v1038_v38, %v846_v16 }
 0x3fc   :  { %v766_v40 = vpop.f32.mrf.mxu1 }
 0x3fd   :  { %793 = vst [vmem:[#allocation10 + $0x78] sm:$0xff] %v775_v39  ;;  %v767_v41 = vadd.f32 %v846_v16, %v766_v40 }
 0x3ff   :  { %791 = vst [vmem:[#allocation10 + $0x68] sm:$0xff] %v767_v41 }
 0x400   :  { %1171 = shalt.err (!%p1168_p10)
}
 0x401   :  { %s1195_s20 = smov 128   ;;  %s1196_s21 = smov 8  }
 0x402   :  { %805 = dma.vmem_to_hbm [thread:$0]  %s800_s18, 2048, %s1303_s6, [#allocation4], %s1195_s20, %s1195_s20, %s1196_s21  }
 0x403   :  { %1186 = dma.done.wait [#allocation4], 2048  }
 0x404   :  { %1187 = vsyncadd [#allocation4], 4294965248 }
 0x405   :  { %809 = vsyncpa [#allocation3], 1 }
 0x406   :  { %810 = vsyncpa [#allocation6], 1 }
 0x407   :  { %811 = vsyncpa [#allocation9], 1 }
 0x408   :  { %812 = vsyncpa [#allocation4], 1 }

</bundles_post_ra>
